<compile_context>
chip_gen: v7x
topology: tpu7x:2x2x1
jax: 0.10.0
libtpu: 0.0.40
codegen_flags: <defaults>
</compile_context>

<pallas_src>
import functools
import math

import jax
import jax.numpy as jnp
from jax.experimental import pallas as pl
from jax.experimental.pallas import tpu as pltpu


_INV_SQRT2 = 1.0 / math.sqrt(2.0)
_SQRT_2_OVER_PI = math.sqrt(2.0 / math.pi)


def _gelu(x, approximate):
    if approximate:
        # tanh approximation (EUP op, cheaper epilogue) -- opt-in only.
        return 0.5 * x * (1.0 + jnp.tanh(_SQRT_2_OVER_PI * (x + 0.044715 * x * x * x)))
    # PyTorch F.gelu default: exact erf-based gelu (computed in f32 here).
    return 0.5 * x * (1.0 + jax.lax.erf(x * _INV_SQRT2))


def _round_up(a, b):
    return (a + b - 1) // b * b


# ---------------------------------------------------------------------------
# Kernels
# ---------------------------------------------------------------------------
def _geglu_kernel_fused(x_ref, w_ref, b_ref, o_ref, *, approximate):
    """Single k-step: no accumulator scratch, dot + epilogue fused."""
    # x: (tm, tk); w: (tk, 2*tn) [val | gate]; b: (1, 2*tn); o: (tm, tn)
    h = jnp.dot(x_ref[...], w_ref[...],
                preferred_element_type=jnp.float32) + b_ref[...]
    tn = o_ref.shape[-1]
    val = h[:, :tn]
    gate = h[:, tn:]
    o_ref[...] = (val * _gelu(gate, approximate)).astype(o_ref.dtype)


def _geglu_kernel_acc(x_ref, w_ref, b_ref, o_ref, acc_ref, *, approximate):
    """Multi k-step: f32 VMEM accumulator, init/finalize via pl.when."""
    k = pl.program_id(2)

    @pl.when(k == 0)
    def _():
        acc_ref[...] = jnp.zeros_like(acc_ref)

    acc_ref[...] += jnp.dot(x_ref[...], w_ref[...],
                            preferred_element_type=jnp.float32)

    @pl.when(k == pl.num_programs(2) - 1)
    def _():
        h = acc_ref[...] + b_ref[...]
        tn = o_ref.shape[-1]
        val = h[:, :tn]
        gate = h[:, tn:]
        o_ref[...] = (val * _gelu(gate, approximate)).astype(o_ref.dtype)


# ---------------------------------------------------------------------------
# Planning / packing helpers
# ---------------------------------------------------------------------------
def _plan_features(dim_in, dim_out, block_n, block_k):
    tn = min(_round_up(dim_out, 128), _round_up(block_n, 128))
    Np = _round_up(dim_out, tn)
    if block_k is None:
        # Collapse the reduction grid to one step for typical GEGLU dim_in.
        tk = min(_round_up(dim_in, 128), 2048)
    else:
        tk = min(_round_up(dim_in, 128), _round_up(block_k, 128))
    Kp = _round_up(dim_in, tk)
    return tn, Np, tk, Kp


def _pack_params(w, b, dim_out, tn, Np, Kp, cdt):
    """Split / cast / pad / tile-interleave the Linear params (done ONCE)."""
    dim_in = w.shape[0]
    ng = Np // tn

    def pad_w(wh):
        return jnp.pad(wh.astype(cdt), ((0, Kp - dim_in), (0, Np - dim_out)))

    wv = pad_w(w[:, :dim_out])
    wg = pad_w(w[:, dim_out:])
    # Column-tile interleave: [val_tile0 | gate_tile0 | val_tile1 | gate_tile1 ...]
    w_packed = jnp.concatenate(
        [wv.reshape(Kp, ng, tn), wg.reshape(Kp, ng, tn)], axis=-1
    ).reshape(Kp, 2 * Np)

    def pad_b(bh):
        return jnp.pad(bh.astype(jnp.float32), (0, Np - dim_out))

    bv = pad_b(b[:dim_out])
    bg = pad_b(b[dim_out:])
    b_packed = jnp.concatenate(
        [bv.reshape(ng, tn), bg.reshape(ng, tn)], axis=-1
    ).reshape(1, 2 * Np)
    return w_packed, b_packed


def _vmem_estimate(tm, tn, tk, cdt_size, out_size, multi_k):
    b = 2 * tm * tk * cdt_size           # x, double-buffered
    b += 2 * tk * 2 * tn * cdt_size      # packed weight, double-buffered
    b += 2 * 2 * tn * 4                  # bias (f32), double-buffered
    b += 2 * tm * tn * out_size          # output, double-buffered
    if multi_k:
        b += tm * 2 * tn * 4             # f32 accumulator scratch
    return b


# ---------------------------------------------------------------------------
# Core pallas_call wrapper (token-side tiling per call)
# ---------------------------------------------------------------------------
def _geglu_core(x, w_packed, b_packed, *, dim_in, dim_out, tn, Np, tk, Kp,
                block_tokens, compute_dtype, approximate, out_dtype):
    *lead, d_in = x.shape
    assert d_in == dim_in, f"x last dim {d_in} != dim_in {dim_in}"
    T = math.prod(lead) if lead else 1
    # No-op when the caller already supplies compute_dtype activations.
    x2 = x.reshape(T, dim_in).astype(compute_dtype)

    cdt_size = jnp.dtype(compute_dtype).itemsize
    out_size = jnp.dtype(out_dtype).itemsize
    sub = 8 if cdt_size == 4 else 16                    # sublane-native token tile

    tm = min(_round_up(block_tokens, sub), _round_up(T, sub))
    grid_k = Kp // tk
    multi_k = grid_k > 1

    # Keep the pipelined working set within a budget safe on v5e/v6e/v7x.
    budget = 28 << 20
    while tm > sub and _vmem_estimate(tm, tn, tk, cdt_size, out_size, multi_k) > budget:
        tm = max(sub, _round_up(tm // 2, sub))

    # Megacore balance: keep >= 2 parallel tiles when the token axis allows it.
    if (pl.cdiv(T, tm) * (Np // tn)) < 2 and T > sub:
        tm = _round_up(pl.cdiv(T, 2), sub)

    Tp = _round_up(T, tm)
    if (Tp, Kp) != (T, dim_in):
        x2 = jnp.pad(x2, ((0, Tp - T), (0, Kp - dim_in)))

    grid_i, grid_j = Tp // tm, Np // tn

    # Bytes include re-streaming: x read once per column tile, weights once per
    # token tile; output written once.
    cost = pl.CostEstimate(
        flops=2 * T * dim_in * (2 * dim_out),
        transcendentals=T * dim_out,
        bytes_accessed=(grid_j * Tp * Kp * cdt_size
                        + grid_i * Kp * 2 * Np * cdt_size
                        + grid_i * 2 * Np * 4
                        + Tp * Np * out_size),
    )

    vmem_limit = int(min(max(
        _vmem_estimate(tm, tn, tk, cdt_size, out_size, multi_k) + (4 << 20),
        16 << 20), 64 << 20))

    if not multi_k:
        kernel = functools.partial(_geglu_kernel_fused, approximate=approximate)
        grid = (grid_i, grid_j)
        in_specs = [
            pl.BlockSpec((tm, tk), lambda i, j: (i, 0)),          # x
            pl.BlockSpec((tk, 2 * tn), lambda i, j: (0, j)),      # packed w
            pl.BlockSpec((1, 2 * tn), lambda i, j: (0, j)),       # packed b
        ]
        out_specs = pl.BlockSpec((tm, tn), lambda i, j: (i, j))
        scratch = []
        dims = ("parallel", "parallel")
    else:
        kernel = functools.partial(_geglu_kernel_acc, approximate=approximate)
        grid = (grid_i, grid_j, grid_k)
        in_specs = [
            pl.BlockSpec((tm, tk), lambda i, j, k: (i, k)),       # x
            pl.BlockSpec((tk, 2 * tn), lambda i, j, k: (k, j)),   # packed w
            pl.BlockSpec((1, 2 * tn), lambda i, j, k: (0, j)),    # packed b
        ]
        out_specs = pl.BlockSpec((tm, tn), lambda i, j, k: (i, j))
        scratch = [pltpu.VMEM((tm, 2 * tn), jnp.float32)]
        dims = ("parallel", "parallel", "arbitrary")

    out_p = pl.pallas_call(
        kernel,
        out_shape=jax.ShapeDtypeStruct((Tp, Np), out_dtype),
        grid_spec=pltpu.PrefetchScalarGridSpec(
            num_scalar_prefetch=0,
            grid=grid,
            in_specs=in_specs,
            out_specs=out_specs,
            scratch_shapes=scratch,
        ),
        compiler_params=pltpu.CompilerParams(
            dimension_semantics=dims,
            vmem_limit_bytes=vmem_limit,
        ),
        cost_estimate=cost,
    )(x2, w_packed, b_packed)

    out = out_p[:T, :dim_out]
    return out.reshape(*lead, dim_out)


# ---------------------------------------------------------------------------
# Public API
# ---------------------------------------------------------------------------
def make_geglu(w, b, *, block_tokens=512, block_n=512, block_k=None,
               compute_dtype=jnp.bfloat16, approximate=False, out_dtype=None):
    """Pack GEGLU Linear params once; return a reusable forward fn.

    w: (dim_in, 2*dim_out)  -- PyTorch nn.Linear weight, already transposed.
    b: (2*dim_out,)
    compute_dtype: MXU operand dtype (bf16 default; float32 is the slow path
    whose matmul uses default TPU precision, i.e. not materially more accurate
    than bf16 operands with f32 accumulation).
    """
    dim_in, two_dout = w.shape
    dim_out = two_dout // 2
    tn, Np, tk, Kp = _plan_features(dim_in, dim_out, block_n, block_k)
    w_packed, b_packed = _pack_params(w, b, dim_out, tn, Np, Kp, compute_dtype)

    def fn(x):
        odt = x.dtype if out_dtype is None else out_dtype
        return _geglu_core(x, w_packed, b_packed,
                           dim_in=dim_in, dim_out=dim_out,
                           tn=tn, Np=Np, tk=tk, Kp=Kp,
                           block_tokens=block_tokens,
                           compute_dtype=compute_dtype,
                           approximate=approximate,
                           out_dtype=odt)

    return fn


def geglu(x, w, b, **kwargs):
    """One-shot convenience wrapper (re-packs weights on every call; prefer
    make_geglu for layers called repeatedly with static weights)."""
    return make_geglu(w, b, **kwargs)(x)


# ---------------------------------------------------------------------------
# Pure-JAX reference
# ---------------------------------------------------------------------------
def geglu_ref(x, w, b):
    h = x @ w + b
    dim_out = w.shape[1] // 2
    val, gate = h[..., :dim_out], h[..., dim_out:]
    return val * _gelu(gate, approximate=False)


if __name__ == "__main__":
    key = jax.random.PRNGKey(0)
    kx, kw, kb = jax.random.split(key, 3)

    B, N, dim_in, dim_out = 2, 8, 32, 32
    x = jax.random.normal(kx, (B, N, dim_in), jnp.float32)
    # Synthetic Linear(dim_in, 2*dim_out) weights, already transposed to (in, out).
    w = jax.random.normal(kw, (dim_in, 2 * dim_out), jnp.float32) * 0.05
    b = jax.random.normal(kb, (2 * dim_out,), jnp.float32) * 0.05

    ref = geglu_ref(x, w, b)

    # Default fast path: bf16 MXU operands, f32 accumulation, weights packed once.
    geglu_fn = make_geglu(w, b)
    out = geglu_fn(x)
    jax.block_until_ready(out)
    assert out.shape == (B, N, dim_out)
    assert jnp.allclose(out, ref, atol=2e-2, rtol=2e-2)

    # f32-operand path (tight tolerance).
    out_f32 = geglu(x, w, b, compute_dtype=jnp.float32)
    jax.block_until_ready(out_f32)
    assert out_f32.shape == (B, N, dim_out)
    assert jnp.allclose(out_f32, ref, atol=1e-5, rtol=1e-5)

    print("KERNEL_OK")
</pallas_src>

<mosaic_0001>
module attributes {stable_mosaic.version = 11 : i64} {
  func.func @_geglu_kernel_fused(%arg0: i32, %arg1: i32, %arg2: memref<16x128xbf16, #tpu.memory_space<vmem>>, %arg3: memref<128x256xbf16, #tpu.memory_space<vmem>>, %arg4: memref<1x256xf32, #tpu.memory_space<vmem>>, %arg5: memref<16x128xf32, #tpu.memory_space<vmem>>) attributes {dimension_semantics = [#tpu.dimension_semantics<parallel>, #tpu.dimension_semantics<parallel>], iteration_bounds = array<i64: 1, 1>, scalar_prefetch = 0 : i64, scratch_operands = 0 : i64, tpu.core_type = #tpu.core_type<tc>, window_params = [{transform_indices = @transform_0, window_bounds = array<i64: 16, 128>}, {transform_indices = @transform_1, window_bounds = array<i64: 128, 256>}, {transform_indices = @transform_2, window_bounds = array<i64: 1, 256>}, {transform_indices = @transform_3, window_bounds = array<i64: 16, 128>}]} {
    %c0 = arith.constant 0 : index
    %c0_0 = arith.constant 0 : index
    %0 = vector.load %arg2[%c0, %c0_0] : memref<16x128xbf16, #tpu.memory_space<vmem>>, vector<16x128xbf16>
    %c0_1 = arith.constant 0 : index
    %c0_2 = arith.constant 0 : index
    %1 = vector.load %arg3[%c0_1, %c0_2] : memref<128x256xbf16, #tpu.memory_space<vmem>>, vector<128x256xbf16>
    %cst = arith.constant dense<0.000000e+00> : vector<16x256xf32>
    %2 = tpu.matmul %0, %1, %cst {dimension_numbers = #tpu.dot_dimension_numbers<[1], [0], [0], [1], [0, 0, 1, 1], [], []>} : vector<16x128xbf16>, vector<128x256xbf16>, vector<16x256xf32> -> vector<16x256xf32>
    %c0_3 = arith.constant 0 : index
    %c0_4 = arith.constant 0 : index
    %3 = vector.load %arg4[%c0_3, %c0_4] : memref<1x256xf32, #tpu.memory_space<vmem>>, vector<1x256xf32>
    %4 = vector.broadcast %3 : vector<1x256xf32> to vector<16x256xf32>
    %5 = arith.addf %2, %4 : vector<16x256xf32>
    %6 = vector.extract_strided_slice %5 {offsets = [0, 0], sizes = [16, 128], strides = [1, 1]} : vector<16x256xf32> to vector<16x128xf32>
    %7 = vector.extract_strided_slice %5 {offsets = [0, 128], sizes = [16, 128], strides = [1, 1]} : vector<16x256xf32> to vector<16x128xf32>
    %cst_5 = arith.constant 5.000000e-01 : f32
    %8 = vector.broadcast %cst_5 : f32 to vector<16x128xf32>
    %9 = arith.mulf %8, %7 : vector<16x128xf32>
    %cst_6 = arith.constant 0.707106769 : f32
    %10 = vector.broadcast %cst_6 : f32 to vector<16x128xf32>
    %11 = arith.mulf %7, %10 : vector<16x128xf32>
    %12 = math.erf %11 : vector<16x128xf32>
    %cst_7 = arith.constant 1.000000e+00 : f32
    %13 = vector.broadcast %cst_7 : f32 to vector<16x128xf32>
    %14 = arith.addf %13, %12 : vector<16x128xf32>
    %15 = arith.mulf %9, %14 : vector<16x128xf32>
    %16 = arith.mulf %6, %15 : vector<16x128xf32>
    %c0_8 = arith.constant 0 : index
    %c0_9 = arith.constant 0 : index
    %17 = vector.load %arg5[%c0_8, %c0_9] : memref<16x128xf32, #tpu.memory_space<vmem>>, vector<16x128xf32>
    tpu.vector_store %arg5[%c0_8, %c0_9], %16 {strides = array<i32>} : memref<16x128xf32, #tpu.memory_space<vmem>>, vector<16x128xf32>,
    return
  }
  func.func @transform_0(%arg0: i32, %arg1: i32) -> (i32, i32) {
    %c0_i32 = arith.constant 0 : i32
    %c0_i32_0 = arith.constant 0 : i32
    return %arg0, %c0_i32 : i32, i32
  }
  func.func @transform_1(%arg0: i32, %arg1: i32) -> (i32, i32) {
    %c0_i32 = arith.constant 0 : i32
    %c0_i32_0 = arith.constant 0 : i32
    return %c0_i32, %arg1 : i32, i32
  }
  func.func @transform_2(%arg0: i32, %arg1: i32) -> (i32, i32) {
    %c0_i32 = arith.constant 0 : i32
    %c0_i32_0 = arith.constant 0 : i32
    return %c0_i32, %arg1 : i32, i32
  }
  func.func @transform_3(%arg0: i32, %arg1: i32) -> (i32, i32) {
    %c0_i32 = arith.constant 0 : i32
    return %arg0, %arg1 : i32, i32
  }
}

</mosaic_0001>

<bundles_post_ra>
// kernel: tpu_custom_call.1
= control target key start
LH: loop header
LB: loop body
LE: loop exit
PB: predicated region body
PF: predicated region fallthrough
CT: control target
= control target key end

     0   :  { %8 = vsyncpa [#allocation3], 0  ;;  %s434_s0 = inlined_call_operand.hbm [shape: bf16[16,128], index: 0, kind: input, shape index: {}]   ;;  %s435_s1 = inlined_call_operand.hbm [shape: bf16[128,256], index: 1, kind: input, shape index: {}]   ;;  %s436_s2 = inlined_call_operand.vmem [shape: f32[1,256], index: 2, kind: input, shape index: {}]   ;;  %s437_s3 = inlined_call_operand.hbm [shape: f32[16,128], index: 3, kind: output, shape index: {}]  }
   0x1   :  { %9 = vsyncpa [#allocation6], 0 }
   0x2   :  { %10 = vsyncpa [#allocation4], 0  ;;  %s361_s12 = smov [#allocation2]   ;;  %s289_s16 = scalar_lea.hbm %s434_s0, 128 }
   0x3   :  { %s16_s13 = sshll.u32 %s361_s12, 4  ;;  %p290_p0 = scmp.ne.s32.totalorder %s434_s0, %s289_s16  ;;  %s17_s13 = int_to_ptr.vmem [resolvable:$true] %s16_s13 }
   0x4   :  { %p293_p1 = scmp.lt.u32.totalorder %s289_s16, %s434_s0 }
   0x6   :  { %p295_p2 = pnand %p293_p1, %p290_p0 }
   0x8   :  { %298 = shalt.err (!%p295_p2)
}
   0x9   :  { %s299_s21 = scalar_lea.vmem %s17_s13, 128  ;;  %p304_p4 = scmp.lt.s32.totalorder %s17_s13, %s17_s13 }
   0xa   :  { %p300_p3 = scmp.ne.s32.totalorder %s17_s13, %s299_s21  ;;  %p305_p5 = scmp.lt.s32.totalorder %s299_s21, %s299_s21 }
   0xc   :  { %p306_p6 = por %p305_p5, %p304_p4 }
   0xe   :  { %p307_p7 = pnand %p306_p6, %p300_p3 }
  0x10   :  { %310 = shalt.err (!%p307_p7)
}
  0x11   :  { %s362_s22 = smov 64   ;;  %s363_s23 = smov 4  }
  0x12   :  { %22 = dma.hbm_to_vmem [thread:$0]  %s434_s0, 128, %s17_s13, [#allocation3], %s362_s22, %s362_s22, %s363_s23  }
  0x13   :  { %s364_s26 = smov [#allocation5]   ;;  %s311_s30 = scalar_lea.hbm %s435_s1, 2048 }
  0x14   :  { %s28_s27 = sshll.u32 %s364_s26, 4  ;;  %p312_p8 = scmp.ne.s32.totalorder %s435_s1, %s311_s30  ;;  %s29_s27 = int_to_ptr.vmem [resolvable:$true] %s28_s27 }
  0x15   :  { %p315_p9 = scmp.lt.u32.totalorder %s311_s30, %s435_s1 }
  0x17   :  { %p317_p10 = pnand %p315_p9, %p312_p8 }
  0x19   :  { %320 = shalt.err (!%p317_p10)
}
  0x1a   :  { %s321_s8 = scalar_lea.vmem %s29_s27, 2048  ;;  %p326_p12 = scmp.lt.s32.totalorder %s29_s27, %s29_s27 }
  0x1b   :  { %p322_p11 = scmp.ne.s32.totalorder %s29_s27, %s321_s8  ;;  %p327_p13 = scmp.lt.s32.totalorder %s321_s8, %s321_s8 }
  0x1d   :  { %p328_p0 = por %p327_p13, %p326_p12 }
  0x1f   :  { %p329_p1 = pnand %p328_p0, %p322_p11 }
  0x21   :  { %332 = shalt.err (!%p329_p1)
}
  0x22   :  { %s365_s0 = smov 128   ;;  %s366_s9 = smov 8  }
  0x23   :  { %34 = dma.hbm_to_vmem [thread:$0]  %s435_s1, 2048, %s29_s27, [#allocation6], %s365_s0, %s365_s0, %s366_s9  }
  0x24   :  { %355 = dma.done.wait [#allocation3], 128  }
  0x25   :  { %356 = vsyncadd [#allocation3], 4294967168 }
  0x26   :  { %357 = dma.done.wait [#allocation6], 2048  }
  0x27   :  { %358 = vsyncadd [#allocation6], 4294965248  ;;  %v367_v0 = vmov 0   ;;  %v260_v1 = vld [vmem:[#allocation5 + $0x4] ss:$8 sps:$4 sm:$0xff]   ;;  %v284_v17 = vld [vmem:[#allocation2] sm:$0xff]   ;;  %v64_v18 = vlaneseq }
  0x28   :  { %192 = vmatprep.mubr.bf16.mxu0 %v367_v0  ;;  %v262_v2 = vld [vmem:[#allocation5] ss:$8 sps:$4 sm:$0xff]   ;;  %160 = vmatprep.subr.bf16.mxu0 %v260_v1  ;;  %v263_v3 = vld [vmem:[#allocation5 + $0x14] ss:$8 sps:$4 sm:$0xff]   ;;  %v265_v4 = vld [vmem:[#allocation5 + $0x10] ss:$8 sps:$4 sm:$0xff]  }
  0x29   :  { %161 = vmatpush1.bf16.msra.mxu0 %v262_v2  ;;  %v266_v5 = vld [vmem:[#allocation5 + $0x24] ss:$8 sps:$4 sm:$0xff]   ;;  %v268_v6 = vld [vmem:[#allocation5 + $0x20] ss:$8 sps:$4 sm:$0xff]   ;;  %v269_v7 = vld [vmem:[#allocation5 + $0x34] ss:$8 sps:$4 sm:$0xff]  }
  0x2a   :  { %162 = vmatprep.subr.bf16.mxu0 %v263_v3  ;;  %v271_v8 = vld [vmem:[#allocation5 + $0x30] ss:$8 sps:$4 sm:$0xff]   ;;  %v272_v9 = vld [vmem:[#allocation5 + $0x44] ss:$8 sps:$4 sm:$0xff]   ;;  %v274_v10 = vld [vmem:[#allocation5 + $0x40] ss:$8 sps:$4 sm:$0xff]  }
  0x2b   :  { %v275_v11 = vld [vmem:[#allocation5 + $0x54] ss:$8 sps:$4 sm:$0xff]   ;;  %v277_v12 = vld [vmem:[#allocation5 + $0x50] ss:$8 sps:$4 sm:$0xff]   ;;  %v278_v13 = vld [vmem:[#allocation5 + $0x64] ss:$8 sps:$4 sm:$0xff]  }
  0x2c   :  { %v280_v14 = vld [vmem:[#allocation5 + $0x60] ss:$8 sps:$4 sm:$0xff]   ;;  %v281_v15 = vld [vmem:[#allocation5 + $0x74] ss:$8 sps:$4 sm:$0xff]   ;;  %v283_v16 = vld [vmem:[#allocation5 + $0x70] ss:$8 sps:$4 sm:$0xff]  }
  0x2d   :  { %163 = vmatpush1.bf16.msra.mxu0 %v265_v4  ;;  %v65_v19 = vshrl.u32 %v64_v18, 7  ;;  %v62_v21 = vld [vmem:[%s436_s2] sm:$0x3]  ;;  %s368_s2 = smov [#allocation7]  }
  0x2e   :  { %164 = vmatprep.subr.bf16.mxu0 %v266_v5  ;;  %s222_s13 = sshll.u32 %s368_s2, 4  ;;  %s223_s13 = int_to_ptr.vmem [resolvable:$true] %s222_s13 }
  0x2f   :  { %v70_v20 = vsub.s32 1, %v65_v19  ;;  %v66_v31 = vsub.s32 0, %v65_v19  ;;  %s333_s14 = scalar_lea.vmem %s223_s13, 256  ;;  %p338_p3 = scmp.lt.s32.totalorder %s223_s13, %s223_s13 }
  0x30   :  { %p334_p2 = scmp.ne.s32.totalorder %s223_s13, %s333_s14  ;;  %p339_p4 = scmp.lt.s32.totalorder %s333_s14, %s333_s14 }
  0x31   :  { %165 = vmatpush1.bf16.msra.mxu0 %v268_v6  ;;  %v71_v22 = vrot.slane %v62_v21, %v70_v20  ;;  %v67_v32 = vrot.slane %v62_v21, %v66_v31 }
  0x32   :  { %166 = vmatprep.subr.bf16.mxu0 %v269_v7  ;;  %p340_p5 = por %p339_p4, %p338_p3 }
  0x34   :  { %p341_p6 = pnand %p340_p5, %p334_p2 }
  0x35   :  { %167 = vmatpush1.bf16.msra.mxu0 %v271_v8 }
  0x36   :  { %168 = vmatprep.subr.bf16.mxu0 %v272_v9 }
  0x39   :  { %169 = vmatpush1.bf16.msra.mxu0 %v274_v10 }
  0x3a   :  { %170 = vmatprep.subr.bf16.mxu0 %v275_v11 }
  0x3d   :  { %171 = vmatpush1.bf16.msra.mxu0 %v277_v12 }
  0x3e   :  { %172 = vmatprep.subr.bf16.mxu0 %v278_v13 }
  0x41   :  { %173 = vmatpush1.bf16.msra.mxu0 %v280_v14 }
  0x42   :  { %174 = vmatprep.subr.bf16.mxu0 %v281_v15 }
  0x45   :  { %175 = vmatpush1.bf16.msra.mxu0 %v283_v16 }
  0x48   :  { %193 = vmatmul.mubr.bf16.vlgmr.msra.gmra.mrb[0].mxu0 %v284_v17 }
 0x11b   :  { %v194_v23 = vpop.f32.mrb[0].mxu0 }
 0x11c   :  { %v196_v24 = vpop.f32.mrb[1].mxu0  ;;  %v195_v37 = vadd.f32 %v194_v23, %v67_v32 }
 0x11d   :  { %v197_v25 = vadd.f32 %v196_v24, %v71_v22  ;;  %v198_v26 = vpop.f32.mrb[2].mxu0 }
 0x11e   :  { %v200_v27 = vpop.f32.mrb[3].mxu0  ;;  %v199_v41 = vadd.f32 %v198_v26, %v67_v32 }
 0x11f   :  { %v205_v28 = vmul.f32 0.70710677, %v197_v25  ;;  %v201_v29 = vadd.f32 %v200_v27, %v71_v22  ;;  %v203_v34 = vmul.f32 0.5, %v197_v25 }
 0x121   :  { %285 = verf.f32 %v205_v28  ;;  %v206_v30 = vmul.f32 0.70710677, %v201_v29  ;;  %v204_v39 = vmul.f32 0.5, %v201_v29 }
 0x123   :  { %287 = verf.f32 %v206_v30 }
 0x12b   :  { %v286_v33 = vpop.eup %285 }
 0x12c   :  { %v209_v35 = vadd.f32 1.0, %v286_v33 }
 0x12d   :  { %v288_v36 = vpop.eup %287 }
 0x12e   :  { %v211_v38 = vmul.f32 %v209_v35, %v203_v34  ;;  %v210_v40 = vadd.f32 1.0, %v288_v36 }
 0x130   :  { %v212_v42 = vmul.f32 %v210_v40, %v204_v39  ;;  %v213_v43 = vmul.f32 %v211_v38, %v195_v37 }
 0x132   :  { %v214_v44 = vmul.f32 %v212_v42, %v199_v41  ;;  %215 = vst [vmem:[#allocation7] sm:$0xff] %v213_v43 }
 0x134   :  { %216 = vst [vmem:[#allocation7 + $0x8] sm:$0xff] %v214_v44 }
 0x135   :  { %344 = shalt.err (!%p341_p6)
}
 0x136   :  { %s345_s17 = scalar_lea.hbm %s437_s3, 256 }
 0x137   :  { %p346_p7 = scmp.ne.s32.totalorder %s437_s3, %s345_s17  ;;  %p349_p8 = scmp.lt.u32.totalorder %s345_s17, %s437_s3 }
 0x139   :  { %p351_p9 = pnand %p349_p8, %p346_p7 }
 0x13b   :  { %354 = shalt.err (!%p351_p9)
}
 0x13c   :  { %228 = dma.vmem_to_hbm [thread:$0]  %s223_s13, 256, %s437_s3, [#allocation4], %s365_s0, %s365_s0, %s366_s9  }
 0x13d   :  { %359 = dma.done.wait [#allocation4], 256  }
 0x13e   :  { %360 = vsyncadd [#allocation4], 4294967040 }
 0x13f   :  { %232 = vsyncpa [#allocation3], 1 }
 0x140   :  { %233 = vsyncpa [#allocation6], 1 }
 0x141   :  { %234 = vsyncpa [#allocation4], 1 }

</bundles_post_ra>
